<compile_context>
chip_gen: v5e
topology: v5e:2x2
jax: 0.10.0
libtpu: 0.0.40
codegen_flags: <defaults>
</compile_context>

<pallas_src>
import functools

import jax
import jax.numpy as jnp
from jax.experimental import pallas as pl
from jax.experimental.pallas import tpu as pltpu

ALPHA = 0.25
GAMMA = 2.0  # gamma == 2 handled as an explicit square below (no float pow)


def _focal_loss_kernel(logits_ref, targets_ref, out_ref, acc_ref, *, n_rows):
    i = pl.program_id(1)  # reduction axis within this core's chunk of tiles

    @pl.when(i == 0)
    def _init():
        acc_ref[...] = jnp.zeros_like(acc_ref)

    tn, c = logits_ref.shape

    # Global row indices of this tile (grid = (core_split, tiles_per_core)).
    tile_idx = pl.program_id(0) * pl.num_programs(1) + i
    row_ids = jax.lax.broadcasted_iota(jnp.int32, (tn, 1), 0)
    row_valid = (tile_idx * tn + row_ids) < n_rows          # (tn, 1) bool

    x = logits_ref[...].astype(jnp.float32)                 # (tn, C), upcast in-kernel
    x = jnp.where(row_valid, x, 0.0)                        # neutralize OOB/garbage rows
    t = targets_ref[...]                                    # (tn, 1) int32

    # Numerically stable log-softmax pieces (class axis is the true C; no lane padding
    # ever hits HBM).
    m = jnp.max(x, axis=-1, keepdims=True)
    shifted = x - m
    exp_shifted = jnp.exp(shifted)
    sumexp = jnp.sum(exp_shifted, axis=-1, keepdims=True)
    lse = jnp.log(sumexp)

    # One-hot via compare against a small (1, C) class-id row (no full-tile iota).
    cls_row = jax.lax.broadcasted_iota(jnp.int32, (1, c), 1)
    onehot = (cls_row == t).astype(jnp.float32)              # (tn, C)
    shifted_t = jnp.sum(onehot * shifted, axis=-1, keepdims=True)
    exp_t = jnp.sum(onehot * exp_shifted, axis=-1, keepdims=True)

    # Per-sample CE; clamp >= 0 so (1 - pt) can never go negative.
    ce = jnp.maximum(lse - shifted_t, 0.0)
    # pt = exp(-ce) without a second row-wise exp: reuse exp_shifted.
    # (Use pl.reciprocal(sumexp, approx=True) instead of the divide if EUP-bound.)
    pt = exp_t / sumexp
    w = jnp.maximum(1.0 - pt, 0.0)
    focal = (ALPHA * w) * w * ce                              # gamma = 2 -> explicit square

    # Elementwise VALU accumulate; mask invalid rows with a select (blocks NaN/Inf).
    acc_ref[...] += jnp.where(row_valid, focal, 0.0)

    @pl.when(i == pl.num_programs(1) - 1)
    def _finalize():
        out_ref[...] = jnp.sum(acc_ref[...], keepdims=True)   # single reduce per core


def _choose_tile_n(n, c, tile_n=None):
    """Pick a row-tile size: ~4 MiB f32 working set, rounded to sublane multiples."""
    c_lanes = ((c + 127) // 128) * 128
    if tile_n is None:
        # 4 MiB f32 working tile: big enough to amortize the ~0.35us/step overhead,
        # small enough that f32 temporaries + double-buffered inputs fit v7x's 64 MiB.
        target_bytes = 4 * 1024 * 1024
        tile_n = max(8, target_bytes // (c_lanes * 4))
    n8 = ((n + 7) // 8) * 8
    tile_n = min(int(tile_n), n8)
    if tile_n > n:
        tile_n = max(8, (n // 8) * 8)   # keep the block inside the array when possible
    tile_n = max(8, (tile_n // 8) * 8)
    return tile_n


def _vmem_limit_bytes():
    try:
        cap = pltpu.get_tpu_info().vmem_capacity_bytes
    except Exception:
        cap = 64 * 1024 * 1024
    # ~3/4 of physical VMEM, capped at 96 MiB -> 48 MiB on v7x, 96 MiB on v5e/v6e.
    return int(min(cap * 3 // 4, 96 * 1024 * 1024))


def focal_loss(logits, targets, *, tile_n=None, num_core_splits=2):
    """logits: (N, C) float32/bfloat16, targets: (N,) int -> scalar float32 mean loss."""
    n, c = logits.shape
    tn = _choose_tile_n(n, c, tile_n)
    num_tiles = -(-n // tn)
    splits = max(1, min(num_core_splits, num_tiles))   # leading "parallel" axis (v7x 2 TCs)
    tiles_per_core = -(-num_tiles // splits)

    t2 = targets.reshape(n, 1).astype(jnp.int32)

    def tile_map(s, i):
        # Clamp so a core's trailing (empty) tiles map to a valid block; their rows are
        # masked out in-kernel via the program-id row check, so they contribute zero.
        return (jnp.minimum(s * tiles_per_core + i, num_tiles - 1), 0)

    kernel = functools.partial(_focal_loss_kernel, n_rows=n)

    cost = pl.CostEstimate(
        flops=10 * n * c,
        transcendentals=n * c + 2 * n,
        bytes_accessed=n * c * logits.dtype.itemsize + n * 4 + splits * 4,
    )

    partials = pl.pallas_call(
        kernel,
        out_shape=jax.ShapeDtypeStruct((splits, 1), jnp.float32),
        grid_spec=pltpu.PrefetchScalarGridSpec(
            num_scalar_prefetch=0,
            grid=(splits, tiles_per_core),
            in_specs=[
                pl.BlockSpec((tn, c), tile_map),   # last dim == full C: no lane padding
                pl.BlockSpec((tn, 1), tile_map),
            ],
            out_specs=pl.BlockSpec((1, 1), lambda s, i: (s, 0)),
            scratch_shapes=[pltpu.VMEM((tn, 1), jnp.float32)],
        ),
        compiler_params=pltpu.CompilerParams(
            dimension_semantics=("parallel", "arbitrary"),
            vmem_limit_bytes=_vmem_limit_bytes(),
        ),
        cost_estimate=cost,
    )(logits, t2)

    return jnp.sum(partials) * (1.0 / n)


def _reference(logits, targets):
    x = logits.astype(jnp.float32)
    logp = jax.nn.log_softmax(x, axis=-1)
    ce = -jnp.take_along_axis(logp, targets[:, None], axis=-1)[:, 0]
    pt = jnp.exp(-ce)
    return jnp.mean(ALPHA * (1.0 - pt) ** GAMMA * ce)


if __name__ == "__main__":
    key = jax.random.PRNGKey(0)
    k1, k2, k3, k4 = jax.random.split(key, 4)

    # test 1: small f32 case, single tile, single core split
    N1, C1 = 8, 16
    logits1 = jax.random.normal(k1, (N1, C1), dtype=jnp.float32)
    targets1 = jax.random.randint(k2, (N1,), 0, C1, dtype=jnp.int32)
    loss1 = jax.block_until_ready(focal_loss(logits1, targets1))
    ref1 = _reference(logits1, targets1)
    assert jnp.allclose(loss1, ref1, atol=1e-5, rtol=1e-4), (loss1, ref1)

    # test 2: bf16 logits, explicit small tile -> multi-tile grid, 2-way core split,
    # partial last tile masked in-kernel (no wrapper padding anywhere)
    N2, C2 = 300, 10
    logits2 = jax.random.normal(k3, (N2, C2), dtype=jnp.bfloat16)
    targets2 = jax.random.randint(k4, (N2,), 0, C2, dtype=jnp.int32)
    loss2 = jax.block_until_ready(focal_loss(logits2, targets2, tile_n=64))
    ref2 = _reference(logits2, targets2)
    assert jnp.allclose(loss2, ref2, atol=1e-5, rtol=1e-4), (loss2, ref2)

    # test 3: same data, default (large) tile path -> N not a multiple of the tile,
    # one partial tile per core, core 1's tile is mostly out-of-bounds rows
    loss3 = jax.block_until_ready(focal_loss(logits2.astype(jnp.float32), targets2))
    ref3 = _reference(logits2.astype(jnp.float32), targets2)
    assert jnp.allclose(loss3, ref3, atol=1e-5, rtol=1e-4), (loss3, ref3)

    print("KERNEL_OK")
</pallas_src>

<mosaic_0001>
module attributes {stable_mosaic.version = 11 : i64} {
  func.func @_focal_loss_kernel(%arg0: i32, %arg1: i32, %arg2: memref<8x16xf32, #tpu.memory_space<vmem>>, %arg3: memref<8x1xi32, #tpu.memory_space<vmem>>, %arg4: memref<1x1xf32, #tpu.memory_space<vmem>>, %arg5: memref<8x1xf32, #tpu.memory_space<vmem>>) attributes {dimension_semantics = [#tpu.dimension_semantics<parallel>, #tpu.dimension_semantics<arbitrary>], iteration_bounds = array<i64: 1, 1>, scalar_prefetch = 0 : i64, scratch_operands = 1 : i64, tpu.core_type = #tpu.core_type<tc>, window_params = [{transform_indices = @transform_0, window_bounds = array<i64: 8, 16>}, {transform_indices = @transform_1, window_bounds = array<i64: 8, 1>}, {transform_indices = @transform_2, window_bounds = array<i64: 1, 1>}]} {
    %c0_i32 = arith.constant 0 : i32
    %0 = arith.cmpi eq, %arg1, %c0_i32 : i32
    %1 = arith.extui %0 : i1 to i32
    %c0_i32_0 = arith.constant 0 : i32
    %2 = arith.cmpi ne, %1, %c0_i32_0 : i32
    scf.if %2 {
      %cst_20 = arith.constant 0.000000e+00 : f32
      %57 = vector.broadcast %cst_20 : f32 to vector<8x1xf32>
      %c0_21 = arith.constant 0 : index
      %c0_22 = arith.constant 0 : index
      %58 = vector.load %arg5[%c0_21, %c0_22] : memref<8x1xf32, #tpu.memory_space<vmem>>, vector<8x1xf32>
      tpu.vector_store %arg5[%c0_21, %c0_22], %57 {strides = array<i32>} : memref<8x1xf32, #tpu.memory_space<vmem>>, vector<8x1xf32>,
    } else {
    }
    %c1_i32 = arith.constant 1 : i32
    %3 = arith.muli %arg0, %c1_i32 : i32
    %4 = arith.addi %3, %arg1 : i32
    %5 = tpu.iota {dimensions = array<i32: 0>} : vector<8x1xi32>
    %c8_i32 = arith.constant 8 : i32
    %6 = arith.muli %4, %c8_i32 : i32
    %7 = vector.broadcast %6 : i32 to vector<8x1xi32>
    %8 = arith.addi %7, %5 : vector<8x1xi32>
    %c8_i32_1 = arith.constant 8 : i32
    %9 = vector.broadcast %c8_i32_1 : i32 to vector<8x1xi32>
    %10 = arith.cmpi slt, %8, %9 : vector<8x1xi32>
    %c0 = arith.constant 0 : index
    %c0_2 = arith.constant 0 : index
    %11 = vector.load %arg2[%c0, %c0_2] : memref<8x16xf32, #tpu.memory_space<vmem>>, vector<8x16xf32>
    %cst = arith.constant 0.000000e+00 : f32
    %12 = vector.shape_cast %10 : vector<8x1xi1> to vector<8x1xi1>
    %13 = vector.broadcast %12 : vector<8x1xi1> to vector<8x16xi1>
    %14 = vector.broadcast %cst : f32 to vector<8x16xf32>
    %15 = arith.select %13, %11, %14 : vector<8x16xi1>, vector<8x16xf32>
    %c0_3 = arith.constant 0 : index
    %c0_4 = arith.constant 0 : index
    %16 = vector.load %arg3[%c0_3, %c0_4] : memref<8x1xi32, #tpu.memory_space<vmem>>, vector<8x1xi32>
    %cst_5 = arith.constant dense<0xFF800000> : vector<8xf32>
    %17 = vector.multi_reduction <maximumf>, %15, %cst_5 [1] : vector<8x16xf32> to vector<8xf32>
    %18 = vector.shape_cast %17 : vector<8xf32> to vector<8x1xf32>
    %19 = vector.broadcast %18 : vector<8x1xf32> to vector<8x16xf32>
    %20 = arith.subf %15, %19 : vector<8x16xf32>
    %21 = math.exp %20 : vector<8x16xf32>
    %cst_6 = arith.constant dense<0.000000e+00> : vector<8xf32>
    %22 = vector.multi_reduction <add>, %21, %cst_6 [1] : vector<8x16xf32> to vector<8xf32>
    %23 = vector.shape_cast %22 : vector<8xf32> to vector<8x1xf32>
    %24 = math.log %23 : vector<8x1xf32>
    %25 = tpu.iota {dimensions = array<i32: 1>} : vector<1x16xi32>
    %26 = vector.broadcast %25 : vector<1x16xi32> to vector<8x16xi32>
    %27 = vector.broadcast %16 : vector<8x1xi32> to vector<8x16xi32>
    %28 = arith.cmpi eq, %26, %27 : vector<8x16xi32>
    %29 = arith.extui %28 : vector<8x16xi1> to vector<8x16xi32>
    %30 = arith.sitofp %29 : vector<8x16xi32> to vector<8x16xf32>
    %31 = arith.mulf %30, %20 : vector<8x16xf32>
    %cst_7 = arith.constant dense<0.000000e+00> : vector<8xf32>
    %32 = vector.multi_reduction <add>, %31, %cst_7 [1] : vector<8x16xf32> to vector<8xf32>
    %33 = vector.shape_cast %32 : vector<8xf32> to vector<8x1xf32>
    %34 = arith.mulf %30, %21 : vector<8x16xf32>
    %cst_8 = arith.constant dense<0.000000e+00> : vector<8xf32>
    %35 = vector.multi_reduction <add>, %34, %cst_8 [1] : vector<8x16xf32> to vector<8xf32>
    %36 = vector.shape_cast %35 : vector<8xf32> to vector<8x1xf32>
    %37 = arith.subf %24, %33 : vector<8x1xf32>
    %cst_9 = arith.constant 0.000000e+00 : f32
    %38 = vector.broadcast %cst_9 : f32 to vector<8x1xf32>
    %39 = arith.maximumf %37, %38 : vector<8x1xf32>
    %40 = arith.divf %36, %23 : vector<8x1xf32>
    %cst_10 = arith.constant 1.000000e+00 : f32
    %41 = vector.broadcast %cst_10 : f32 to vector<8x1xf32>
    %42 = arith.subf %41, %40 : vector<8x1xf32>
    %cst_11 = arith.constant 0.000000e+00 : f32
    %43 = vector.broadcast %cst_11 : f32 to vector<8x1xf32>
    %44 = arith.maximumf %42, %43 : vector<8x1xf32>
    %cst_12 = arith.constant 2.500000e-01 : f32
    %45 = vector.broadcast %cst_12 : f32 to vector<8x1xf32>
    %46 = arith.mulf %45, %44 : vector<8x1xf32>
    %47 = arith.mulf %46, %44 : vector<8x1xf32>
    %48 = arith.mulf %47, %39 : vector<8x1xf32>
    %c0_13 = arith.constant 0 : index
    %c0_14 = arith.constant 0 : index
    %49 = vector.load %arg5[%c0_13, %c0_14] : memref<8x1xf32, #tpu.memory_space<vmem>>, vector<8x1xf32>
    %cst_15 = arith.constant 0.000000e+00 : f32
    %50 = vector.broadcast %cst_15 : f32 to vector<8x1xf32>
    %51 = arith.select %10, %48, %50 : vector<8x1xi1>, vector<8x1xf32>
    %52 = arith.addf %49, %51 : vector<8x1xf32>
    %c0_16 = arith.constant 0 : index
    %c0_17 = arith.constant 0 : index
    %53 = vector.load %arg5[%c0_16, %c0_17] : memref<8x1xf32, #tpu.memory_space<vmem>>, vector<8x1xf32>
    tpu.vector_store %arg5[%c0_16, %c0_17], %52 {strides = array<i32>} : memref<8x1xf32, #tpu.memory_space<vmem>>, vector<8x1xf32>,
    %c0_i32_18 = arith.constant 0 : i32
    %54 = arith.cmpi eq, %arg1, %c0_i32_18 : i32
    %55 = arith.extui %54 : i1 to i32
    %c0_i32_19 = arith.constant 0 : i32
    %56 = arith.cmpi ne, %55, %c0_i32_19 : i32
    scf.if %56 {
      %c0_20 = arith.constant 0 : index
      %c0_21 = arith.constant 0 : index
      %57 = vector.load %arg5[%c0_20, %c0_21] : memref<8x1xf32, #tpu.memory_space<vmem>>, vector<8x1xf32>
      %58 = vector.shape_cast %57 : vector<8x1xf32> to vector<1x8x1xf32>
      %cst_22 = arith.constant dense<0.000000e+00> : vector<1xf32>
      %59 = vector.multi_reduction <add>, %58, %cst_22 [1, 2] : vector<1x8x1xf32> to vector<1xf32>
      %60 = vector.shape_cast %59 : vector<1xf32> to vector<1x1x1xf32>
      %61 = vector.extract %60[0, 0, 0] : f32 from vector<1x1x1xf32>
      %62 = vector.broadcast %61 : f32 to vector<1x1xf32>
      %c0_23 = arith.constant 0 : index
      %c0_24 = arith.constant 0 : index
      %63 = vector.load %arg4[%c0_23, %c0_24] : memref<1x1xf32, #tpu.memory_space<vmem>>, vector<1x1xf32>
      tpu.vector_store %arg4[%c0_23, %c0_24], %62 {strides = array<i32>} : memref<1x1xf32, #tpu.memory_space<vmem>>, vector<1x1xf32>,
    } else {
    }
    return
  }
  func.func @transform_0(%arg0: i32, %arg1: i32) -> (i32, i32) {
    %c1_i32 = arith.constant 1 : i32
    %0 = arith.muli %arg0, %c1_i32 : i32
    %1 = arith.addi %0, %arg1 : i32
    %c0_i32 = arith.constant 0 : i32
    %2 = arith.minsi %1, %c0_i32 : i32
    %c0_i32_0 = arith.constant 0 : i32
    %c0_i32_1 = arith.constant 0 : i32
    return %2, %c0_i32_0 : i32, i32
  }
  func.func @transform_1(%arg0: i32, %arg1: i32) -> (i32, i32) {
    %c1_i32 = arith.constant 1 : i32
    %0 = arith.muli %arg0, %c1_i32 : i32
    %1 = arith.addi %0, %arg1 : i32
    %c0_i32 = arith.constant 0 : i32
    %2 = arith.minsi %1, %c0_i32 : i32
    %c0_i32_0 = arith.constant 0 : i32
    %c0_i32_1 = arith.constant 0 : i32
    return %2, %c0_i32_0 : i32, i32
  }
  func.func @transform_2(%arg0: i32, %arg1: i32) -> (i32, i32) {
    %c0_i32 = arith.constant 0 : i32
    %c0_i32_0 = arith.constant 0 : i32
    return %arg0, %c0_i32 : i32, i32
  }
}

</mosaic_0001>

<bundles_post_ra>
// kernel: tpu_custom_call.1
= control target key start
LH: loop header
LB: loop body
LE: loop exit
PB: predicated region body
PF: predicated region fallthrough
CT: control target
= control target key end

     0   :  { %vm84_vm0 = vcmask 130048   ;;  %s257_s0 = inlined_call_operand.vmem [shape: f32[8,16], index: 0, kind: input, shape index: {}]   ;;  %s258_s1 = inlined_call_operand.vmem [shape: s32[8,1], index: 1, kind: input, shape index: {}]   ;;  %s259_s2 = inlined_call_operand.hbm [shape: f32[1,1], index: 2, kind: output, shape index: {}]  }
   0x1   :  { %v79_v0 = vld [vmem:[%s257_s0] sm:$0xff] }
   0x2   :  { %7 = vsyncpa [#allocation4], 0  ;;  %v85_v1 = vsel %vm84_vm0, %v79_v0, -inf  ;;  %v223_v2 = vmov 0   ;;  %v83_v3 = vld [vmem:[%s258_s1] sm:$0xff]  ;;  %v96_v9 = vlaneseq  ;;  %v224_v12 = vmov 0.0  }
   0x3   :  { %190 = vset.pattern.permute.xlu0 %v223_v2  ;;  %vm70_vm2 = vcmask 7168   ;;  %s225_s0 = smov [#allocation3]   ;;  %s163_s15 = sshll.u32 %s259_s2, 4  ;;  %vm154_vm7 = vcmask 0   ;;  %s164_s15 = int_to_ptr.hbm [resolvable:$true] %s163_s15 }
   0x4   :  { %86 = vmax.xlane.f32.xlu0 %v85_v1  ;;  %v97_v10 = vand.u32 127, %v96_v9  ;;  %71 = vst.msk [vmem:[#allocation2] sm:$0xff] %vm70_vm2, %v224_v12  ;;  %s161_s1 = sshll.u32 %s225_s0, 4  ;;  %s162_s1 = int_to_ptr.vmem [resolvable:$true] %s161_s1 }
   0xb   :  { %v134_v40 = vld [vmem:[#allocation2] sm:$0xff] }
  0x18   :  { %99 = vperm.xlu0 %190, %v83_v3  }
  0x77   :  { %v87_v4 = vpop.xlane.xlu0 %86 }
  0x78   :  { %v88_v5 = vsub.f32 %v79_v0, %v87_v4 }
  0x7a   :  { %v89_v6 = vmul.f32 1.442695, %v88_v5 }
  0x7c   :  { %191 = vpow2.f32 %v89_v6 }
  0x82   :  { %v192_v7 = vpop.eup %191 }
  0x83   :  { %v91_v8 = vsel %vm84_vm0, %v192_v7, 0.0 }
  0x84   :  { %92 = vadd.xlane.f32.xlu1 %v91_v8 }
  0x8a   :  { %v100_v11 = vpop.permute.xlu0 %99 }
  0x8b   :  { %vm101_vm1 = vcmp.eq.s32.totalorder %v97_v10, %v100_v11 }
  0x8c   :  { %v184_v13 = vsel %vm101_vm1, 1.0, %v224_v12 }
  0x8d   :  { %v108_v14 = vmul.f32 %v192_v7, %v184_v13  ;;  %v104_v15 = vmul.f32 %v184_v13, %v88_v5 }
  0x8f   :  { %v109_v16 = vsel %vm84_vm0, %v108_v14, 0.0  ;;  %v105_v17 = vsel %vm84_vm0, %v104_v15, 0.0 }
  0x90   :  { %110 = vadd.xlane.f32.xlu1 %v109_v16  ;;  %106 = vadd.xlane.f32.xlu2 %v105_v17 }
  0xf7   :  { %v93_v18 = vpop.xlane.xlu1 %92 }
  0xf8   :  { %193 = vrcp.f32 %v93_v18  ;;  %v125_v22 = vand.u32 2147483648, %v93_v18  ;;  %v123_v24 = vand.u32 2147483647, %v93_v18  ;;  %vm119_vm4 = vweird.f32 %v93_v18 }
  0xf9   :  { %195 = vlog2.f32 %v93_v18 }
  0xfa   :  { %v126_v26 = vor.u32 1.1754944e-38, %v125_v22  ;;  %vm124_vm6 = vcmp.eq.f32.partialorder %v123_v24, 8.507059e+37 }
  0xfe   :  { %v194_v19 = vpop.eup %193 }
  0xff   :  { %v115_v20 = vmul.f32 %v194_v19, %v93_v18  ;;  %vm120_vm3 = vweird.f32 %v194_v19  ;;  %v196_v28 = vpop.eup %195 }
 0x100   :  { %vm121_vm5 = vmor %vm119_vm4, %vm120_vm3  ;;  %v95_v34 = vmul.f32 0.6931472, %v196_v28 }
 0x101   :  { %v116_v21 = vsub.f32 1.0, %v115_v20 }
 0x103   :  { %v117_v23 = vmul.f32 %v194_v19, %v116_v21  ;;  %v111_v30 = vpop.xlane.xlu1 %110  ;;  %v107_v32 = vpop.xlane.xlu2 %106 }
 0x104   :  { %v112_v36 = vsub.f32 %v95_v34, %v107_v32 }
 0x105   :  { %v118_v25 = vadd.f32 %v194_v19, %v117_v23 }
 0x106   :  { %v113_v39 = vmax.f32 %v112_v36, 0.0 }
 0x107   :  { %v122_v27 = vsel %vm121_vm5, %v194_v19, %v118_v25 }
 0x108   :  { %v127_v29 = vsel %vm124_vm6, %v126_v26, %v122_v27 }
 0x109   :  { %v128_v31 = vmul.f32 %v127_v29, %v111_v30 }
 0x10b   :  { %v129_v33 = vsub.f32 1.0, %v128_v31 }
 0x10d   :  { %v130_v35 = vmax.f32 %v129_v33, 0.0 }
 0x10f   :  { %v131_v37 = vmul.f32 0.25, %v130_v35 }
 0x111   :  { %v132_v38 = vmul.f32 %v131_v37, %v130_v35 }
 0x113   :  { %v133_v41 = vmul.f32 %v132_v38, %v113_v39 }
 0x115   :  { %v136_v42 = vadd.f32 %v134_v40, %v133_v41 }
 0x117   :  { %138 = vst.msk [vmem:[#allocation2] sm:$0xff] %vm70_vm2, %v136_v42 }
 0x11e   :  { %v142_v43 = vld [vmem:[#allocation2] sm:$0xff] }
 0x11f   :  { %v143_v44 = vsel %vm70_vm2, %v142_v43, 0.0 }
 0x120   :  { %144 = vadd.xlane.f32.xlu2 %v143_v44 }
 0x193   :  { %v145_v45 = vpop.xlane.xlu2 %144 }
 0x194   :  { %v146_v46 = vrot.slane %v145_v45, 4 }
 0x196   :  { %v147_v47 = vadd.f32 %v146_v46, %v145_v45 }
 0x198   :  { %v148_v48 = vrot.slane %v147_v47, 2 }
 0x19a   :  { %v149_v49 = vadd.f32 %v148_v48, %v147_v47 }
 0x19c   :  { %v150_v50 = vrot.slane %v149_v49, 1 }
 0x19e   :  { %v151_v51 = vadd.f32 %v150_v50, %v149_v49 }
 0x1a0   :  { %185 = vpush %v151_v51 }
 0x1d1   :  { %s186_s16 = spop %185 }
 0x1d2   :  { %v153_v52 = vstv %s186_s16 }
 0x1d3   :  { %155 = vst.msk [vmem:[#allocation3] sm:$0x1] %vm154_vm7, %v153_v52 }
 0x1d4   :  { %166 = dma.vmem_to_hbm [thread:$0]  %s162_s1, 16, %s164_s15, [#allocation4]  }
 0x1d5   :  { %221 = dma.done.wait [#allocation4], 16  }
 0x1d6   :  { %222 = vsyncadd [#allocation4], 4294967280 }
 0x1d7   :  { %171 = vsyncpa [#allocation4], 1 }

</bundles_post_ra>
